<compile_context>
chip_gen: v5e
topology: v5e:2x2
jax: 0.10.0
libtpu: 0.0.40
codegen_flags: <defaults>
</compile_context>

<pallas_src>
import functools

import jax
import jax.numpy as jnp
from jax import lax
from jax.experimental import pallas as pl
from jax.experimental.pallas import tpu as pltpu

LANES = 128
SUBLANES = 8
SMALL_N = 1 << 16     # below this, fused XLA is a single HBM pass and near-optimal


def _round_up(x, m):
    return ((x + m - 1) // m) * m


def _chip_config():
    """Returns (num_tensorcores_to_split_over, max_tile_rows) for this TPU."""
    kind = ""
    try:
        kind = jax.devices()[0].device_kind.lower()
    except Exception:
        pass
    # v5e / v6e are single-TensorCore; v4 / v5p (megacore) and v7x expose 2 TCs.
    if "lite" in kind or "v5e" in kind or "v6" in kind:
        cores = 1
    elif "v7" in kind or "v4" in kind or "v5p" in kind or "v5" in kind:
        cores = 2
    else:
        cores = 1
    # v5e's scoped-VMEM default is small -> keep tiles a bit smaller there.
    max_rows = 4096 if ("lite" in kind or "v5e" in kind) else 8192
    return cores, max_rows


def _focal_terms(p, t, alpha, gamma):
    """Fused focal-loss terms (f32) -- used for the small-N fallback and the tail."""
    bce = -(t * jnp.maximum(jnp.log(p), -100.0)
            + (1.0 - t) * jnp.maximum(jnp.log(1.0 - p), -100.0))
    pt = jnp.exp(-bce)
    return alpha * (1.0 - pt) ** gamma * bce


def _focal_loss_kernel(o_ref, t_ref, out_ref, *, alpha, gamma, rows, tile_rows,
                       chunks_per_core, binary_targets, need_mask):
    k = pl.program_id(1)

    @pl.when(k == 0)
    def _():
        out_ref[...] = jnp.zeros_like(out_ref)

    p = o_ref[...].astype(jnp.float32)
    t = t_ref[...].astype(jnp.float32)

    if binary_targets:
        # Hard 0/1 labels: 1 transcendental / element (opt-in; differs for soft t).
        sel = jnp.where(t > 0.5, p, 1.0 - p)
        bce = -jnp.maximum(jnp.log(sel), -100.0)
        pt = sel
    else:
        # torch.binary_cross_entropy clamps each log term at -100.
        log_p = jnp.maximum(jnp.log(p), -100.0)
        log_1p = jnp.maximum(jnp.log(1.0 - p), -100.0)
        bce = -(t * log_p + (1.0 - t) * log_1p)
        pt = jnp.exp(-bce)

    one_m_pt = 1.0 - pt
    # gamma / alpha are Python floats -> specialize at trace time (no pow for 2/1/0).
    if gamma == 2.0:
        w = one_m_pt * one_m_pt
    elif gamma == 1.0:
        w = one_m_pt
    elif gamma == 0.0:
        w = None
    else:
        w = one_m_pt ** gamma
    fl = bce if w is None else w * bce
    if alpha != 1.0:
        fl = fl * alpha

    def accumulate(x):
        # (tile_rows,128) -> groups of (8,128) vregs, VPU-added into the resident
        # per-core (8,128) output block (accumulator across the k axis).
        out_ref[...] += x.reshape(tile_rows // SUBLANES, SUBLANES, LANES).sum(axis=0)

    if need_mask:
        blk = pl.program_id(0) * chunks_per_core + k
        block_end = (blk + 1) * tile_rows

        @pl.when(block_end <= rows)          # interior full block: no mask work
        def _():
            accumulate(fl)

        @pl.when(block_end > rows)           # final partial / clamped block
        def _():
            row = lax.broadcasted_iota(jnp.int32, fl.shape, 0) + blk * tile_rows
            # select (not arithmetic) so NaN/inf in stale rows cannot propagate.
            accumulate(jnp.where(row < rows, fl, 0.0))
    else:
        accumulate(fl)


def focal_loss(outputs, targets, *, alpha=1.0, gamma=2.0,
               binary_targets=False, force_pallas=False):
    """Focal loss with logits=False, reduce=True. Returns a scalar f32."""
    assert outputs.shape == targets.shape
    n = int(outputs.size)

    # Contiguous reshapes are free (no copy).
    o_flat = outputs.reshape(-1)
    t_flat = targets.reshape(-1)

    rows = n // LANES
    tail = n - rows * LANES

    # Small-N fast path: fused XLA is already a single optimal HBM pass.
    if (n < SMALL_N and not force_pallas) or rows < SUBLANES:
        fl = _focal_terms(o_flat.astype(jnp.float32), t_flat.astype(jnp.float32),
                          alpha, gamma)
        return jnp.sum(fl) / jnp.float32(n)

    cores, max_tile_rows = _chip_config()
    cores = max(1, min(cores, rows // SUBLANES))   # each core gets >= one 8-row block

    # Adaptive tiling: tile_rows sized to the actual row count so the clamped
    # index_map never wastes a whole extra tile of HBM traffic per core.
    chunks = pl.cdiv(rows, cores * max_tile_rows)                  # chunks per core
    tile_rows = _round_up(pl.cdiv(rows, cores * chunks), SUBLANES)
    tile_rows = min(tile_rows, (rows // SUBLANES) * SUBLANES)      # block <= array rows
    nblocks = pl.cdiv(rows, tile_rows)
    chunks = pl.cdiv(nblocks, cores)
    covered_rows = cores * chunks * tile_rows
    need_mask = covered_rows != rows                               # static

    # Main (rows x 128) slab in NATIVE dtype; no padding.  When tail != 0 the
    # prefix slice materializes once; the <128-element tail is reduced in JAX.
    # TODO(synk): a fully copy-free ragged path would need manual 1-D HBM DMA.
    o2 = o_flat[: rows * LANES].reshape(rows, LANES)
    t2 = t_flat[: rows * LANES].reshape(rows, LANES)

    def in_map(j, k):
        # Clamp so an over-provisioned chunk re-reads a valid block; the in-kernel
        # row mask zeroes its contribution (rare with adaptive tile sizing).
        return (jnp.minimum(j * chunks + k, nblocks - 1), 0)

    kernel = functools.partial(
        _focal_loss_kernel,
        alpha=float(alpha), gamma=float(gamma), rows=rows, tile_rows=tile_rows,
        chunks_per_core=chunks, binary_targets=binary_targets, need_mask=need_mask)

    in_itemsize = o2.dtype.itemsize
    blk_elems = tile_rows * LANES
    # 2 inputs double-buffered + generous allowance for full-block f32 temporaries.
    vmem_limit = 2 * 2 * blk_elems * in_itemsize + 6 * blk_elems * 4 + (4 << 20)
    vmem_limit = min(max(vmem_limit, 32 << 20), 56 << 20)   # stay under v7x physical

    n_main = rows * LANES
    out_bytes = cores * SUBLANES * LANES * 4

    partials = pl.pallas_call(
        kernel,
        out_shape=jax.ShapeDtypeStruct((cores * SUBLANES, LANES), jnp.float32),
        grid_spec=pltpu.PrefetchScalarGridSpec(
            num_scalar_prefetch=0,
            grid=(cores, chunks),
            in_specs=[
                pl.BlockSpec((tile_rows, LANES), in_map),
                pl.BlockSpec((tile_rows, LANES), in_map),
            ],
            out_specs=pl.BlockSpec((SUBLANES, LANES), lambda j, k: (j, 0)),
        ),
        compiler_params=pltpu.CompilerParams(
            dimension_semantics=("parallel", "arbitrary"),
            vmem_limit_bytes=int(vmem_limit)),
        cost_estimate=pl.CostEstimate(
            flops=12 * n_main,
            transcendentals=(1 if binary_targets else 3) * n_main,
            bytes_accessed=2 * n_main * in_itemsize + out_bytes),
    )(o2, t2)

    total = jnp.sum(partials)
    if tail:
        o_tail = o_flat[rows * LANES:].astype(jnp.float32)
        t_tail = t_flat[rows * LANES:].astype(jnp.float32)
        total = total + jnp.sum(_focal_terms(o_tail, t_tail, alpha, gamma))
    return total / jnp.float32(n)


def focal_loss_ref(outputs, targets, alpha=1.0, gamma=2.0):
    p = outputs.astype(jnp.float32)
    t = targets.astype(jnp.float32)
    return jnp.mean(_focal_terms(p, t, alpha, gamma))


if __name__ == "__main__":
    key = jax.random.PRNGKey(0)
    k1, k2, k3, k4 = jax.random.split(key, 4)

    B, C, H, W = 2, 4, 16, 16  # NCHW-shaped predictions/targets
    # logits=False -> "outputs" are probabilities in (0, 1)
    outputs = jax.nn.sigmoid(jax.random.normal(k1, (B, C, H, W), jnp.float32))
    targets = jax.random.bernoulli(k2, 0.3, (B, C, H, W)).astype(jnp.float32)

    # 1) Standard path (force the Pallas kernel even though N is small).
    loss = jax.block_until_ready(
        focal_loss(outputs, targets, alpha=1.0, gamma=2.0, force_pallas=True))
    ref = focal_loss_ref(outputs, targets)
    assert jnp.allclose(loss, ref, rtol=1e-5, atol=1e-6), (loss, ref)

    # 2) Hard-label fast path (targets here are exactly 0/1).
    loss_bin = jax.block_until_ready(
        focal_loss(outputs, targets, binary_targets=True, force_pallas=True))
    assert jnp.allclose(loss_bin, ref, rtol=1e-5, atol=1e-6), (loss_bin, ref)

    # 3) Non-multiple-of-128 size: kernel on the main slab + JAX tail reduction.
    n_odd = 1365
    o_odd = jax.nn.sigmoid(jax.random.normal(k3, (n_odd,), jnp.float32))
    t_odd = jax.random.bernoulli(k4, 0.3, (n_odd,)).astype(jnp.float32)
    loss_odd = jax.block_until_ready(focal_loss(o_odd, t_odd, force_pallas=True))
    ref_odd = focal_loss_ref(o_odd, t_odd)
    assert jnp.allclose(loss_odd, ref_odd, rtol=1e-5, atol=1e-6), (loss_odd, ref_odd)

    print("KERNEL_OK")
</pallas_src>

<mosaic_0001>
module attributes {stable_mosaic.version = 11 : i64} {
  func.func @_focal_loss_kernel(%arg0: i32, %arg1: i32, %arg2: memref<16x128xf32, #tpu.memory_space<vmem>>, %arg3: memref<16x128xf32, #tpu.memory_space<vmem>>, %arg4: memref<8x128xf32, #tpu.memory_space<vmem>>) attributes {dimension_semantics = [#tpu.dimension_semantics<parallel>, #tpu.dimension_semantics<arbitrary>], iteration_bounds = array<i64: 1, 1>, scalar_prefetch = 0 : i64, scratch_operands = 0 : i64, tpu.core_type = #tpu.core_type<tc>, window_params = [{transform_indices = @transform_0, window_bounds = array<i64: 16, 128>}, {transform_indices = @transform_1, window_bounds = array<i64: 16, 128>}, {transform_indices = @transform_2, window_bounds = array<i64: 8, 128>}]} {
    %c0_i32 = arith.constant 0 : i32
    %0 = arith.cmpi eq, %arg1, %c0_i32 : i32
    %1 = arith.extui %0 : i1 to i32
    %c0_i32_0 = arith.constant 0 : i32
    %2 = arith.cmpi ne, %1, %c0_i32_0 : i32
    scf.if %2 {
      %cst_15 = arith.constant 0.000000e+00 : f32
      %32 = vector.broadcast %cst_15 : f32 to vector<8x128xf32>
      %c0_16 = arith.constant 0 : index
      %c0_17 = arith.constant 0 : index
      %33 = vector.load %arg4[%c0_16, %c0_17] : memref<8x128xf32, #tpu.memory_space<vmem>>, vector<8x128xf32>
      tpu.vector_store %arg4[%c0_16, %c0_17], %32 {strides = array<i32>} : memref<8x128xf32, #tpu.memory_space<vmem>>, vector<8x128xf32>,
    } else {
    }
    %c0 = arith.constant 0 : index
    %c0_1 = arith.constant 0 : index
    %3 = vector.load %arg2[%c0, %c0_1] : memref<16x128xf32, #tpu.memory_space<vmem>>, vector<16x128xf32>
    %c0_2 = arith.constant 0 : index
    %c0_3 = arith.constant 0 : index
    %4 = vector.load %arg3[%c0_2, %c0_3] : memref<16x128xf32, #tpu.memory_space<vmem>>, vector<16x128xf32>
    %5 = math.log %3 : vector<16x128xf32>
    %cst = arith.constant -1.000000e+02 : f32
    %6 = vector.broadcast %cst : f32 to vector<16x128xf32>
    %7 = arith.maximumf %5, %6 : vector<16x128xf32>
    %cst_4 = arith.constant 1.000000e+00 : f32
    %8 = vector.broadcast %cst_4 : f32 to vector<16x128xf32>
    %9 = arith.subf %8, %3 : vector<16x128xf32>
    %10 = math.log %9 : vector<16x128xf32>
    %cst_5 = arith.constant -1.000000e+02 : f32
    %11 = vector.broadcast %cst_5 : f32 to vector<16x128xf32>
    %12 = arith.maximumf %10, %11 : vector<16x128xf32>
    %13 = arith.mulf %4, %7 : vector<16x128xf32>
    %cst_6 = arith.constant 1.000000e+00 : f32
    %14 = vector.broadcast %cst_6 : f32 to vector<16x128xf32>
    %15 = arith.subf %14, %4 : vector<16x128xf32>
    %16 = arith.mulf %15, %12 : vector<16x128xf32>
    %17 = arith.addf %13, %16 : vector<16x128xf32>
    %cst_7 = arith.constant 0.000000e+00 : f32
    %18 = vector.broadcast %cst_7 : f32 to vector<16x128xf32>
    %19 = arith.subf %18, %17 : vector<16x128xf32>
    %cst_8 = arith.constant 0.000000e+00 : f32
    %20 = vector.broadcast %cst_8 : f32 to vector<16x128xf32>
    %21 = arith.subf %20, %19 : vector<16x128xf32>
    %22 = math.exp %21 : vector<16x128xf32>
    %cst_9 = arith.constant 1.000000e+00 : f32
    %23 = vector.broadcast %cst_9 : f32 to vector<16x128xf32>
    %24 = arith.subf %23, %22 : vector<16x128xf32>
    %25 = arith.mulf %24, %24 : vector<16x128xf32>
    %26 = arith.mulf %25, %19 : vector<16x128xf32>
    %c0_10 = arith.constant 0 : index
    %c0_11 = arith.constant 0 : index
    %27 = vector.load %arg4[%c0_10, %c0_11] : memref<8x128xf32, #tpu.memory_space<vmem>>, vector<8x128xf32>
    %28 = vector.shape_cast %26 : vector<16x128xf32> to vector<2x8x128xf32>
    %cst_12 = arith.constant dense<0.000000e+00> : vector<8x128xf32>
    %29 = vector.multi_reduction <add>, %28, %cst_12 [0] : vector<2x8x128xf32> to vector<8x128xf32>
    %30 = arith.addf %27, %29 : vector<8x128xf32>
    %c0_13 = arith.constant 0 : index
    %c0_14 = arith.constant 0 : index
    %31 = vector.load %arg4[%c0_13, %c0_14] : memref<8x128xf32, #tpu.memory_space<vmem>>, vector<8x128xf32>
    tpu.vector_store %arg4[%c0_13, %c0_14], %30 {strides = array<i32>} : memref<8x128xf32, #tpu.memory_space<vmem>>, vector<8x128xf32>,
    return
  }
  func.func @transform_0(%arg0: i32, %arg1: i32) -> (i32, i32) {
    %c1_i32 = arith.constant 1 : i32
    %0 = arith.muli %arg0, %c1_i32 : i32
    %1 = arith.addi %0, %arg1 : i32
    %c0_i32 = arith.constant 0 : i32
    %2 = arith.minsi %1, %c0_i32 : i32
    %c0_i32_0 = arith.constant 0 : i32
    %c0_i32_1 = arith.constant 0 : i32
    return %2, %c0_i32_0 : i32, i32
  }
  func.func @transform_1(%arg0: i32, %arg1: i32) -> (i32, i32) {
    %c1_i32 = arith.constant 1 : i32
    %0 = arith.muli %arg0, %c1_i32 : i32
    %1 = arith.addi %0, %arg1 : i32
    %c0_i32 = arith.constant 0 : i32
    %2 = arith.minsi %1, %c0_i32 : i32
    %c0_i32_0 = arith.constant 0 : i32
    %c0_i32_1 = arith.constant 0 : i32
    return %2, %c0_i32_0 : i32, i32
  }
  func.func @transform_2(%arg0: i32, %arg1: i32) -> (i32, i32) {
    %c0_i32 = arith.constant 0 : i32
    %c0_i32_0 = arith.constant 0 : i32
    return %arg0, %c0_i32 : i32, i32
  }
}

</mosaic_0001>

<bundles_post_ra>
// kernel: tpu_custom_call.1
= control target key start
LH: loop header
LB: loop body
LE: loop exit
PB: predicated region body
PF: predicated region fallthrough
CT: control target
= control target key end

     0   :  { %7 = vsyncpa [#allocation3], 0  ;;  %s260_s0 = inlined_call_operand.hbm [shape: f32[16,128], index: 0, kind: input, shape index: {}]   ;;  %s261_s1 = inlined_call_operand.hbm [shape: f32[16,128], index: 1, kind: input, shape index: {}]   ;;  %s262_s2 = inlined_call_operand.hbm [shape: f32[8,128], index: 2, kind: output, shape index: {}]  }
   0x1   :  { %8 = vsyncpa [#allocation6], 0 }
   0x2   :  { %9 = vsyncpa [#allocation4], 0  ;;  %s20_s11 = sshll.u32 %s260_s0, 4  ;;  %s231_s12 = smov [#allocation2]   ;;  %s21_s11 = int_to_ptr.hbm [resolvable:$true] %s20_s11 }
   0x3   :  { %s22_s13 = sshll.u32 %s231_s12, 4  ;;  %s39_s16 = sshll.u32 %s261_s1, 4  ;;  %s23_s13 = int_to_ptr.vmem [resolvable:$true] %s22_s13  ;;  %s40_s16 = int_to_ptr.hbm [resolvable:$true] %s39_s16 }
   0x4   :  { %s232_s17 = smov 128   ;;  %s233_s18 = smov 8  }
   0x5   :  { %28 = dma.hbm_to_vmem [thread:$0]  %s21_s11, 256, %s23_s13, [#allocation3], %s232_s17, %s232_s17, %s233_s18  }
   0x6   :  { %s234_s19 = smov [#allocation5]  }
   0x7   :  { %s41_s20 = sshll.u32 %s234_s19, 4  ;;  %s42_s20 = int_to_ptr.vmem [resolvable:$true] %s41_s20 }
   0x8   :  { %47 = dma.hbm_to_vmem [thread:$0]  %s40_s16, 256, %s42_s20, [#allocation6], %s232_s17, %s232_s17, %s233_s18  }
   0x9   :  { %225 = dma.done.wait [#allocation3], 256  }
   0xa   :  { %226 = vsyncadd [#allocation3], 4294967040 }
   0xb   :  { %227 = dma.done.wait [#allocation6], 256  }
   0xc   :  { %228 = vsyncadd [#allocation6], 4294967040  ;;  %v69_v0 = vld [vmem:[#allocation2] sm:$0xff]  ;;  %v70_v1 = vld [vmem:[#allocation2 + $0x8] sm:$0xff]  ;;  %s235_s0 = smov [#allocation7]   ;;  %s120_s23 = sshll.u32 %s262_s2, 4  ;;  %s121_s23 = int_to_ptr.hbm [resolvable:$true] %s120_s23 }
   0xd   :  { %141 = vlog2.f32 %v69_v0  ;;  %v79_v2 = vsub.f32 1.0, %v69_v0  ;;  %v80_v3 = vsub.f32 1.0, %v70_v1  ;;  %v71_v5 = vld [vmem:[#allocation5] sm:$0xff]  ;;  %v72_v7 = vld [vmem:[#allocation5 + $0x8] sm:$0xff]  ;;  %s118_s1 = sshll.u32 %s235_s0, 4  ;;  %s119_s1 = int_to_ptr.vmem [resolvable:$true] %s118_s1 }
   0xe   :  { %143 = vlog2.f32 %v70_v1  ;;  %v89_v14 = vsub.f32 1.0, %v71_v5  ;;  %v90_v17 = vsub.f32 1.0, %v72_v7 }
   0xf   :  { %145 = vlog2.f32 %v79_v2 }
  0x10   :  { %147 = vlog2.f32 %v80_v3 }
  0x13   :  { %v142_v4 = vpop.eup %141 }
  0x14   :  { %v144_v6 = vpop.eup %143  ;;  %v74_v8 = vmul.f32 0.6931472, %v142_v4 }
  0x15   :  { %v146_v9 = vpop.eup %145  ;;  %v76_v10 = vmul.f32 0.6931472, %v144_v6 }
  0x16   :  { %v148_v11 = vpop.eup %147  ;;  %v77_v12 = vmax.f32 %v74_v8, -100.0  ;;  %v82_v13 = vmul.f32 0.6931472, %v146_v9 }
  0x17   :  { %v78_v15 = vmax.f32 %v76_v10, -100.0  ;;  %v84_v16 = vmul.f32 0.6931472, %v148_v11 }
  0x18   :  { %v85_v18 = vmax.f32 %v82_v13, -100.0  ;;  %v87_v19 = vmul.f32 %v77_v12, %v71_v5 }
  0x19   :  { %v86_v20 = vmax.f32 %v84_v16, -100.0  ;;  %v88_v21 = vmul.f32 %v78_v15, %v72_v7 }
  0x1a   :  { %v91_v22 = vmul.f32 %v89_v14, %v85_v18 }
  0x1b   :  { %v92_v23 = vmul.f32 %v90_v17, %v86_v20 }
  0x1c   :  { %v93_v24 = vadd.f32 %v91_v22, %v87_v19 }
  0x1d   :  { %v94_v25 = vadd.f32 %v92_v23, %v88_v21 }
  0x1e   :  { %v95_v26 = vsub.f32 0.0, %v93_v24 }
  0x1f   :  { %v96_v27 = vsub.f32 0.0, %v94_v25 }
  0x20   :  { %v97_v28 = vsub.f32 0.0, %v95_v26 }
  0x21   :  { %v98_v29 = vsub.f32 0.0, %v96_v27 }
  0x22   :  { %v99_v30 = vmul.f32 1.442695, %v97_v28 }
  0x23   :  { %v101_v31 = vmul.f32 1.442695, %v98_v29 }
  0x24   :  { %149 = vpow2.f32 %v99_v30 }
  0x25   :  { %151 = vpow2.f32 %v101_v31 }
  0x2a   :  { %v150_v32 = vpop.eup %149 }
  0x2b   :  { %v152_v33 = vpop.eup %151  ;;  %v103_v34 = vsub.f32 1.0, %v150_v32 }
  0x2c   :  { %v104_v35 = vsub.f32 1.0, %v152_v33 }
  0x2d   :  { %v105_v36 = vmul.f32 %v103_v34, %v103_v34 }
  0x2e   :  { %v106_v37 = vmul.f32 %v104_v35, %v104_v35 }
  0x2f   :  { %v107_v38 = vmul.f32 %v105_v36, %v95_v26 }
  0x30   :  { %v108_v39 = vmul.f32 %v106_v37, %v96_v27 }
  0x32   :  { %v110_v40 = vadd.f32 %v108_v39, %v107_v38 }
  0x34   :  { %112 = vst [vmem:[#allocation7] sm:$0xff] %v110_v40 }
  0x35   :  { %123 = dma.vmem_to_hbm [thread:$0]  %s119_s1, 128, %s121_s23, [#allocation4]  }
  0x36   :  { %229 = dma.done.wait [#allocation4], 128  }
  0x37   :  { %230 = vsyncadd [#allocation4], 4294967168 }
  0x38   :  { %128 = vsyncpa [#allocation3], 1 }
  0x39   :  { %129 = vsyncpa [#allocation6], 1 }
  0x3a   :  { %130 = vsyncpa [#allocation4], 1 }

</bundles_post_ra>
